<compile_context>
chip_gen: v7x
topology: tpu7x:2x2x1
jax: 0.10.0
libtpu: 0.0.40
codegen_flags: <defaults>
</compile_context>

<pallas_src>
import jax
import jax.numpy as jnp
from jax.experimental import pallas as pl
from jax.experimental.pallas import tpu as pltpu


D_IN, D_HID, D_OUT = 2, 20, 3
_DEFAULT_TILE_B = 2048


def mlp_kernel(w1_ref, b1_ref, w2_ref, b2_ref, x_ref, o_ref):
    """x_ref: (2, T) VMEM, o_ref: (3, T) VMEM, params flattened 1-D in SMEM.

    out[m, :] = b2[m] + sum_k w2[k, m] * relu(w1[0, k]*x[0, :] +
                                              w1[1, k]*x[1, :] + b1[k])
    Pure VPU: scalar(SMEM)-broadcast FMAs, batch on lanes.
    """
    x0 = x_ref[0:1, :]                      # (1, T)
    x1 = x_ref[1:2, :]                      # (1, T)

    acc0 = jnp.zeros_like(x0)
    acc1 = jnp.zeros_like(x0)
    acc2 = jnp.zeros_like(x0)

    for k in range(D_HID):                  # static unroll: 20 hidden units
        # Layer 1: Linear(2, 20), one hidden row at a time.
        h_k = w1_ref[k] * x0 + w1_ref[D_HID + k] * x1 + b1_ref[k]
        # Dropout(p=0.4): identity at inference time.  ReLU:
        h_k = jnp.maximum(h_k, 0.0)
        # Layer 2: Linear(20, 3) accumulated as 3 scalar-broadcast FMAs.
        acc0 = acc0 + w2_ref[k * D_OUT + 0] * h_k
        acc1 = acc1 + w2_ref[k * D_OUT + 1] * h_k
        acc2 = acc2 + w2_ref[k * D_OUT + 2] * h_k

    o_ref[0:1, :] = (acc0 + b2_ref[0]).astype(o_ref.dtype)
    o_ref[1:2, :] = (acc1 + b2_ref[1]).astype(o_ref.dtype)
    o_ref[2:3, :] = (acc2 + b2_ref[2]).astype(o_ref.dtype)


def _cost_estimate(batch):
    return pl.CostEstimate(
        flops=2 * batch * (D_IN * D_HID + D_HID * D_OUT),
        transcendentals=0,
        bytes_accessed=4 * batch * (D_IN + D_OUT)
        + 4 * (D_IN * D_HID + D_HID + D_HID * D_OUT + D_OUT),
    )


def _forward_whole(xt, params):
    """Gridless path for small batches: whole problem sits in VMEM/SMEM."""
    B = xt.shape[1]
    smem = pl.BlockSpec(memory_space=pltpu.MemorySpace.SMEM)
    vmem = pl.BlockSpec(memory_space=pltpu.MemorySpace.VMEM)
    return pl.pallas_call(
        mlp_kernel,
        out_shape=jax.ShapeDtypeStruct((D_OUT, B), xt.dtype),
        in_specs=[smem, smem, smem, smem, vmem],
        out_specs=vmem,
        cost_estimate=_cost_estimate(B),
    )(*params, xt)


def _forward_tiled(xt, params, tile_b):
    """Batch-tiled path: lane-dense tiles, parallel batch axis (2 TCs on v7x).

    xt must already be padded so xt.shape[1] % tile_b == 0.
    """
    Bp = xt.shape[1]
    smem = pl.BlockSpec(memory_space=pltpu.MemorySpace.SMEM)
    return pl.pallas_call(
        mlp_kernel,
        out_shape=jax.ShapeDtypeStruct((D_OUT, Bp), xt.dtype),
        grid=(Bp // tile_b,),
        in_specs=[
            smem, smem, smem, smem,
            pl.BlockSpec((D_IN, tile_b), lambda i: (0, i)),
        ],
        out_specs=pl.BlockSpec((D_OUT, tile_b), lambda i: (0, i)),
        compiler_params=pltpu.CompilerParams(
            dimension_semantics=("parallel",)),
        cost_estimate=_cost_estimate(Bp),
    )(*params, xt)


def dnn_drop_forward(x, w1, b1, w2, b2, tile_b=None):
    """Forward pass of DNN_Drop (eval mode).

    x: (B, 2) f32 -> returns (B, 3) f32.
    Small batches (B <= tile_b) use a gridless whole-array call; larger
    batches are zero-padded to a tile multiple and run on a parallel grid.
    """
    B = x.shape[0]
    if tile_b is None:
        tile_b = _DEFAULT_TILE_B
    # Keep tile lane-dense (multiple of 128).
    tile_b = max(128, ((tile_b + 127) // 128) * 128)

    # Lane-dense layout: batch on the last (lane) axis.
    xt = jnp.asarray(x, jnp.float32).T                       # (2, B)
    params = (w1.reshape(-1).astype(jnp.float32),            # (40,)  SMEM
              b1.reshape(-1).astype(jnp.float32),            # (20,)  SMEM
              w2.reshape(-1).astype(jnp.float32),             # (60,)  SMEM
              b2.reshape(-1).astype(jnp.float32))             # (3,)   SMEM

    if B <= tile_b:
        out_t = _forward_whole(xt, params)                   # (3, B)
        return out_t.T                                       # (B, 3)

    # Pad batch to a multiple of tile_b (no silent gridless fallback).
    n_tiles = -(-B // tile_b)
    Bp = n_tiles * tile_b
    if Bp != B:
        xt = jnp.pad(xt, ((0, 0), (0, Bp - B)))
    out_t = _forward_tiled(xt, params, tile_b)               # (3, Bp)
    return out_t[:, :B].T                                    # (B, 3)


def init_params(key):
    """Deterministic init mimicking torch.nn.Linear defaults
    (Kaiming-uniform weights, uniform biases with bound 1/sqrt(fan_in))."""
    k1, k2, k3, k4 = jax.random.split(key, 4)

    bound1 = 1.0 / jnp.sqrt(D_IN)
    w1 = jax.random.uniform(k1, (D_IN, D_HID), jnp.float32, -bound1, bound1)
    b1 = jax.random.uniform(k2, (D_HID,), jnp.float32, -bound1, bound1)

    bound2 = 1.0 / jnp.sqrt(D_HID)
    w2 = jax.random.uniform(k3, (D_HID, D_OUT), jnp.float32, -bound2, bound2)
    b2 = jax.random.uniform(k4, (D_OUT,), jnp.float32, -bound2, bound2)

    return w1, b1, w2, b2


def _reference(x, w1, b1, w2, b2):
    # eval-mode dropout == identity
    return jnp.maximum(x @ w1 + b1, 0.0) @ w2 + b2


if __name__ == "__main__":
    key = jax.random.PRNGKey(0)
    kx, kp, kx2 = jax.random.split(key, 3)
    w1, b1, w2, b2 = init_params(kp)

    # Small-batch gridless path (matches the module's tiny problem size).
    B = 8
    x = jax.random.normal(kx, (B, 2), jnp.float32)
    out = jax.block_until_ready(dnn_drop_forward(x, w1, b1, w2, b2))
    ref = _reference(x, w1, b1, w2, b2)
    assert out.shape == (B, 3)
    assert jnp.allclose(out, ref, atol=1e-5, rtol=1e-5), \
        "mismatch vs reference (gridless)"

    # Large, non-divisible batch -> padded, parallel, lane-dense tiled path.
    B2, TILE_B = 2500, 1024
    x2 = jax.random.normal(kx2, (B2, 2), jnp.float32)
    out2 = jax.block_until_ready(
        dnn_drop_forward(x2, w1, b1, w2, b2, tile_b=TILE_B))
    ref2 = _reference(x2, w1, b1, w2, b2)
    assert out2.shape == (B2, 3)
    assert jnp.allclose(out2, ref2, atol=1e-5, rtol=1e-5), \
        "mismatch vs reference (tiled)"

    print("KERNEL_OK")
</pallas_src>

<mosaic_0001>
module attributes {stable_mosaic.version = 11 : i64} {
  func.func @mlp_kernel(%arg0: memref<40xf32, #tpu.memory_space<smem>>, %arg1: memref<20xf32, #tpu.memory_space<smem>>, %arg2: memref<60xf32, #tpu.memory_space<smem>>, %arg3: memref<3xf32, #tpu.memory_space<smem>>, %arg4: memref<2x8xf32, #tpu.memory_space<vmem>>, %arg5: memref<3x8xf32, #tpu.memory_space<vmem>>) attributes {dimension_semantics = [], scalar_prefetch = 0 : i64, scratch_operands = 0 : i64, tpu.core_type = #tpu.core_type<tc>} {
    %c0 = arith.constant 0 : index
    %c0_0 = arith.constant 0 : index
    %0 = vector.load %arg4[%c0, %c0_0] : memref<2x8xf32, #tpu.memory_space<vmem>>, vector<1x8xf32>
    %c1 = arith.constant 1 : index
    %c0_1 = arith.constant 0 : index
    %1 = vector.load %arg4[%c1, %c0_1] : memref<2x8xf32, #tpu.memory_space<vmem>>, vector<1x8xf32>
    %cst = arith.constant 0.000000e+00 : f32
    %2 = vector.broadcast %cst : f32 to vector<1x8xf32>
    %cst_2 = arith.constant 0.000000e+00 : f32
    %3 = vector.broadcast %cst_2 : f32 to vector<1x8xf32>
    %cst_3 = arith.constant 0.000000e+00 : f32
    %4 = vector.broadcast %cst_3 : f32 to vector<1x8xf32>
    %c0_4 = arith.constant 0 : index
    %5 = memref.load %arg0[%c0_4] : memref<40xf32, #tpu.memory_space<smem>>
    %6 = vector.broadcast %5 : f32 to vector<1x8xf32>
    %7 = arith.mulf %6, %0 : vector<1x8xf32>
    %c20 = arith.constant 20 : index
    %8 = memref.load %arg0[%c20] : memref<40xf32, #tpu.memory_space<smem>>
    %9 = vector.broadcast %8 : f32 to vector<1x8xf32>
    %10 = arith.mulf %9, %1 : vector<1x8xf32>
    %11 = arith.addf %7, %10 : vector<1x8xf32>
    %c0_5 = arith.constant 0 : index
    %12 = memref.load %arg1[%c0_5] : memref<20xf32, #tpu.memory_space<smem>>
    %13 = vector.broadcast %12 : f32 to vector<1x8xf32>
    %14 = arith.addf %11, %13 : vector<1x8xf32>
    %cst_6 = arith.constant 0.000000e+00 : f32
    %15 = vector.broadcast %cst_6 : f32 to vector<1x8xf32>
    %16 = arith.maximumf %14, %15 : vector<1x8xf32>
    %c0_7 = arith.constant 0 : index
    %17 = memref.load %arg2[%c0_7] : memref<60xf32, #tpu.memory_space<smem>>
    %18 = vector.broadcast %17 : f32 to vector<1x8xf32>
    %19 = arith.mulf %18, %16 : vector<1x8xf32>
    %20 = arith.addf %2, %19 : vector<1x8xf32>
    %c1_8 = arith.constant 1 : index
    %21 = memref.load %arg2[%c1_8] : memref<60xf32, #tpu.memory_space<smem>>
    %22 = vector.broadcast %21 : f32 to vector<1x8xf32>
    %23 = arith.mulf %22, %16 : vector<1x8xf32>
    %24 = arith.addf %3, %23 : vector<1x8xf32>
    %c2 = arith.constant 2 : index
    %25 = memref.load %arg2[%c2] : memref<60xf32, #tpu.memory_space<smem>>
    %26 = vector.broadcast %25 : f32 to vector<1x8xf32>
    %27 = arith.mulf %26, %16 : vector<1x8xf32>
    %28 = arith.addf %4, %27 : vector<1x8xf32>
    %c1_9 = arith.constant 1 : index
    %29 = memref.load %arg0[%c1_9] : memref<40xf32, #tpu.memory_space<smem>>
    %30 = vector.broadcast %29 : f32 to vector<1x8xf32>
    %31 = arith.mulf %30, %0 : vector<1x8xf32>
    %c21 = arith.constant 21 : index
    %32 = memref.load %arg0[%c21] : memref<40xf32, #tpu.memory_space<smem>>
    %33 = vector.broadcast %32 : f32 to vector<1x8xf32>
    %34 = arith.mulf %33, %1 : vector<1x8xf32>
    %35 = arith.addf %31, %34 : vector<1x8xf32>
    %c1_10 = arith.constant 1 : index
    %36 = memref.load %arg1[%c1_10] : memref<20xf32, #tpu.memory_space<smem>>
    %37 = vector.broadcast %36 : f32 to vector<1x8xf32>
    %38 = arith.addf %35, %37 : vector<1x8xf32>
    %cst_11 = arith.constant 0.000000e+00 : f32
    %39 = vector.broadcast %cst_11 : f32 to vector<1x8xf32>
    %40 = arith.maximumf %38, %39 : vector<1x8xf32>
    %c3 = arith.constant 3 : index
    %41 = memref.load %arg2[%c3] : memref<60xf32, #tpu.memory_space<smem>>
    %42 = vector.broadcast %41 : f32 to vector<1x8xf32>
    %43 = arith.mulf %42, %40 : vector<1x8xf32>
    %44 = arith.addf %20, %43 : vector<1x8xf32>
    %c4 = arith.constant 4 : index
    %45 = memref.load %arg2[%c4] : memref<60xf32, #tpu.memory_space<smem>>
    %46 = vector.broadcast %45 : f32 to vector<1x8xf32>
    %47 = arith.mulf %46, %40 : vector<1x8xf32>
    %48 = arith.addf %24, %47 : vector<1x8xf32>
    %c5 = arith.constant 5 : index
    %49 = memref.load %arg2[%c5] : memref<60xf32, #tpu.memory_space<smem>>
    %50 = vector.broadcast %49 : f32 to vector<1x8xf32>
    %51 = arith.mulf %50, %40 : vector<1x8xf32>
    %52 = arith.addf %28, %51 : vector<1x8xf32>
    %c2_12 = arith.constant 2 : index
    %53 = memref.load %arg0[%c2_12] : memref<40xf32, #tpu.memory_space<smem>>
    %54 = vector.broadcast %53 : f32 to vector<1x8xf32>
    %55 = arith.mulf %54, %0 : vector<1x8xf32>
    %c22 = arith.constant 22 : index
    %56 = memref.load %arg0[%c22] : memref<40xf32, #tpu.memory_space<smem>>
    %57 = vector.broadcast %56 : f32 to vector<1x8xf32>
    %58 = arith.mulf %57, %1 : vector<1x8xf32>
    %59 = arith.addf %55, %58 : vector<1x8xf32>
    %c2_13 = arith.constant 2 : index
    %60 = memref.load %arg1[%c2_13] : memref<20xf32, #tpu.memory_space<smem>>
    %61 = vector.broadcast %60 : f32 to vector<1x8xf32>
    %62 = arith.addf %59, %61 : vector<1x8xf32>
    %cst_14 = arith.constant 0.000000e+00 : f32
    %63 = vector.broadcast %cst_14 : f32 to vector<1x8xf32>
    %64 = arith.maximumf %62, %63 : vector<1x8xf32>
    %c6 = arith.constant 6 : index
    %65 = memref.load %arg2[%c6] : memref<60xf32, #tpu.memory_space<smem>>
    %66 = vector.broadcast %65 : f32 to vector<1x8xf32>
    %67 = arith.mulf %66, %64 : vector<1x8xf32>
    %68 = arith.addf %44, %67 : vector<1x8xf32>
    %c7 = arith.constant 7 : index
    %69 = memref.load %arg2[%c7] : memref<60xf32, #tpu.memory_space<smem>>
    %70 = vector.broadcast %69 : f32 to vector<1x8xf32>
    %71 = arith.mulf %70, %64 : vector<1x8xf32>
    %72 = arith.addf %48, %71 : vector<1x8xf32>
    %c8 = arith.constant 8 : index
    %73 = memref.load %arg2[%c8] : memref<60xf32, #tpu.memory_space<smem>>
    %74 = vector.broadcast %73 : f32 to vector<1x8xf32>
    %75 = arith.mulf %74, %64 : vector<1x8xf32>
    %76 = arith.addf %52, %75 : vector<1x8xf32>
    %c3_15 = arith.constant 3 : index
    %77 = memref.load %arg0[%c3_15] : memref<40xf32, #tpu.memory_space<smem>>
    %78 = vector.broadcast %77 : f32 to vector<1x8xf32>
    %79 = arith.mulf %78, %0 : vector<1x8xf32>
    %c23 = arith.constant 23 : index
    %80 = memref.load %arg0[%c23] : memref<40xf32, #tpu.memory_space<smem>>
    %81 = vector.broadcast %80 : f32 to vector<1x8xf32>
    %82 = arith.mulf %81, %1 : vector<1x8xf32>
    %83 = arith.addf %79, %82 : vector<1x8xf32>
    %c3_16 = arith.constant 3 : index
    %84 = memref.load %arg1[%c3_16] : memref<20xf32, #tpu.memory_space<smem>>
    %85 = vector.broadcast %84 : f32 to vector<1x8xf32>
    %86 = arith.addf %83, %85 : vector<1x8xf32>
    %cst_17 = arith.constant 0.000000e+00 : f32
    %87 = vector.broadcast %cst_17 : f32 to vector<1x8xf32>
    %88 = arith.maximumf %86, %87 : vector<1x8xf32>
    %c9 = arith.constant 9 : index
    %89 = memref.load %arg2[%c9] : memref<60xf32, #tpu.memory_space<smem>>
    %90 = vector.broadcast %89 : f32 to vector<1x8xf32>
    %91 = arith.mulf %90, %88 : vector<1x8xf32>
    %92 = arith.addf %68, %91 : vector<1x8xf32>
    %c10 = arith.constant 10 : index
    %93 = memref.load %arg2[%c10] : memref<60xf32, #tpu.memory_space<smem>>
    %94 = vector.broadcast %93 : f32 to vector<1x8xf32>
    %95 = arith.mulf %94, %88 : vector<1x8xf32>
    %96 = arith.addf %72, %95 : vector<1x8xf32>
    %c11 = arith.constant 11 : index
    %97 = memref.load %arg2[%c11] : memref<60xf32, #tpu.memory_space<smem>>
    %98 = vector.broadcast %97 : f32 to vector<1x8xf32>
    %99 = arith.mulf %98, %88 : vector<1x8xf32>
    %100 = arith.addf %76, %99 : vector<1x8xf32>
    %c4_18 = arith.constant 4 : index
    %101 = memref.load %arg0[%c4_18] : memref<40xf32, #tpu.memory_space<smem>>
    %102 = vector.broadcast %101 : f32 to vector<1x8xf32>
    %103 = arith.mulf %102, %0 : vector<1x8xf32>
    %c24 = arith.constant 24 : index
    %104 = memref.load %arg0[%c24] : memref<40xf32, #tpu.memory_space<smem>>
    %105 = vector.broadcast %104 : f32 to vector<1x8xf32>
    %106 = arith.mulf %105, %1 : vector<1x8xf32>
    %107 = arith.addf %103, %106 : vector<1x8xf32>
    %c4_19 = arith.constant 4 : index
    %108 = memref.load %arg1[%c4_19] : memref<20xf32, #tpu.memory_space<smem>>
    %109 = vector.broadcast %108 : f32 to vector<1x8xf32>
    %110 = arith.addf %107, %109 : vector<1x8xf32>
    %cst_20 = arith.constant 0.000000e+00 : f32
    %111 = vector.broadcast %cst_20 : f32 to vector<1x8xf32>
    %112 = arith.maximumf %110, %111 : vector<1x8xf32>
    %c12 = arith.constant 12 : index
    %113 = memref.load %arg2[%c12] : memref<60xf32, #tpu.memory_space<smem>>
    %114 = vector.broadcast %113 : f32 to vector<1x8xf32>
    %115 = arith.mulf %114, %112 : vector<1x8xf32>
    %116 = arith.addf %92, %115 : vector<1x8xf32>
    %c13 = arith.constant 13 : index
    %117 = memref.load %arg2[%c13] : memref<60xf32, #tpu.memory_space<smem>>
    %118 = vector.broadcast %117 : f32 to vector<1x8xf32>
    %119 = arith.mulf %118, %112 : vector<1x8xf32>
    %120 = arith.addf %96, %119 : vector<1x8xf32>
    %c14 = arith.constant 14 : index
    %121 = memref.load %arg2[%c14] : memref<60xf32, #tpu.memory_space<smem>>
    %122 = vector.broadcast %121 : f32 to vector<1x8xf32>
    %123 = arith.mulf %122, %112 : vector<1x8xf32>
    %124 = arith.addf %100, %123 : vector<1x8xf32>
    %c5_21 = arith.constant 5 : index
    %125 = memref.load %arg0[%c5_21] : memref<40xf32, #tpu.memory_space<smem>>
    %126 = vector.broadcast %125 : f32 to vector<1x8xf32>
    %127 = arith.mulf %126, %0 : vector<1x8xf32>
    %c25 = arith.constant 25 : index
    %128 = memref.load %arg0[%c25] : memref<40xf32, #tpu.memory_space<smem>>
    %129 = vector.broadcast %128 : f32 to vector<1x8xf32>
    %130 = arith.mulf %129, %1 : vector<1x8xf32>
    %131 = arith.addf %127, %130 : vector<1x8xf32>
    %c5_22 = arith.constant 5 : index
    %132 = memref.load %arg1[%c5_22] : memref<20xf32, #tpu.memory_space<smem>>
    %133 = vector.broadcast %132 : f32 to vector<1x8xf32>
    %134 = arith.addf %131, %133 : vector<1x8xf32>
    %cst_23 = arith.constant 0.000000e+00 : f32
    %135 = vector.broadcast %cst_23 : f32 to vector<1x8xf32>
    %136 = arith.maximumf %134, %135 : vector<1x8xf32>
    %c15 = arith.constant 15 : index
    %137 = memref.load %arg2[%c15] : memref<60xf32, #tpu.memory_space<smem>>
    %138 = vector.broadcast %137 : f32 to vector<1x8xf32>
    %139 = arith.mulf %138, %136 : vector<1x8xf32>
    %140 = arith.addf %116, %139 : vector<1x8xf32>
    %c16 = arith.constant 16 : index
    %141 = memref.load %arg2[%c16] : memref<60xf32, #tpu.memory_space<smem>>
    %142 = vector.broadcast %141 : f32 to vector<1x8xf32>
    %143 = arith.mulf %142, %136 : vector<1x8xf32>
    %144 = arith.addf %120, %143 : vector<1x8xf32>
    %c17 = arith.constant 17 : index
    %145 = memref.load %arg2[%c17] : memref<60xf32, #tpu.memory_space<smem>>
    %146 = vector.broadcast %145 : f32 to vector<1x8xf32>
    %147 = arith.mulf %146, %136 : vector<1x8xf32>
    %148 = arith.addf %124, %147 : vector<1x8xf32>
    %c6_24 = arith.constant 6 : index
    %149 = memref.load %arg0[%c6_24] : memref<40xf32, #tpu.memory_space<smem>>
    %150 = vector.broadcast %149 : f32 to vector<1x8xf32>
    %151 = arith.mulf %150, %0 : vector<1x8xf32>
    %c26 = arith.constant 26 : index
    %152 = memref.load %arg0[%c26] : memref<40xf32, #tpu.memory_space<smem>>
    %153 = vector.broadcast %152 : f32 to vector<1x8xf32>
    %154 = arith.mulf %153, %1 : vector<1x8xf32>
    %155 = arith.addf %151, %154 : vector<1x8xf32>
    %c6_25 = arith.constant 6 : index
    %156 = memref.load %arg1[%c6_25] : memref<20xf32, #tpu.memory_space<smem>>
    %157 = vector.broadcast %156 : f32 to vector<1x8xf32>
    %158 = arith.addf %155, %157 : vector<1x8xf32>
    %cst_26 = arith.constant 0.000000e+00 : f32
    %159 = vector.broadcast %cst_26 : f32 to vector<1x8xf32>
    %160 = arith.maximumf %158, %159 : vector<1x8xf32>
    %c18 = arith.constant 18 : index
    %161 = memref.load %arg2[%c18] : memref<60xf32, #tpu.memory_space<smem>>
    %162 = vector.broadcast %161 : f32 to vector<1x8xf32>
    %163 = arith.mulf %162, %160 : vector<1x8xf32>
    %164 = arith.addf %140, %163 : vector<1x8xf32>
    %c19 = arith.constant 19 : index
    %165 = memref.load %arg2[%c19] : memref<60xf32, #tpu.memory_space<smem>>
    %166 = vector.broadcast %165 : f32 to vector<1x8xf32>
    %167 = arith.mulf %166, %160 : vector<1x8xf32>
    %168 = arith.addf %144, %167 : vector<1x8xf32>
    %c20_27 = arith.constant 20 : index
    %169 = memref.load %arg2[%c20_27] : memref<60xf32, #tpu.memory_space<smem>>
    %170 = vector.broadcast %169 : f32 to vector<1x8xf32>
    %171 = arith.mulf %170, %160 : vector<1x8xf32>
    %172 = arith.addf %148, %171 : vector<1x8xf32>
    %c7_28 = arith.constant 7 : index
    %173 = memref.load %arg0[%c7_28] : memref<40xf32, #tpu.memory_space<smem>>
    %174 = vector.broadcast %173 : f32 to vector<1x8xf32>
    %175 = arith.mulf %174, %0 : vector<1x8xf32>
    %c27 = arith.constant 27 : index
    %176 = memref.load %arg0[%c27] : memref<40xf32, #tpu.memory_space<smem>>
    %177 = vector.broadcast %176 : f32 to vector<1x8xf32>
    %178 = arith.mulf %177, %1 : vector<1x8xf32>
    %179 = arith.addf %175, %178 : vector<1x8xf32>
    %c7_29 = arith.constant 7 : index
    %180 = memref.load %arg1[%c7_29] : memref<20xf32, #tpu.memory_space<smem>>
    %181 = vector.broadcast %180 : f32 to vector<1x8xf32>
    %182 = arith.addf %179, %181 : vector<1x8xf32>
    %cst_30 = arith.constant 0.000000e+00 : f32
    %183 = vector.broadcast %cst_30 : f32 to vector<1x8xf32>
    %184 = arith.maximumf %182, %183 : vector<1x8xf32>
    %c21_31 = arith.constant 21 : index
    %185 = memref.load %arg2[%c21_31] : memref<60xf32, #tpu.memory_space<smem>>
    %186 = vector.broadcast %185 : f32 to vector<1x8xf32>
    %187 = arith.mulf %186, %184 : vector<1x8xf32>
    %188 = arith.addf %164, %187 : vector<1x8xf32>
    %c22_32 = arith.constant 22 : index
    %189 = memref.load %arg2[%c22_32] : memref<60xf32, #tpu.memory_space<smem>>
    %190 = vector.broadcast %189 : f32 to vector<1x8xf32>
    %191 = arith.mulf %190, %184 : vector<1x8xf32>
    %192 = arith.addf %168, %191 : vector<1x8xf32>
    %c23_33 = arith.constant 23 : index
    %193 = memref.load %arg2[%c23_33] : memref<60xf32, #tpu.memory_space<smem>>
    %194 = vector.broadcast %193 : f32 to vector<1x8xf32>
    %195 = arith.mulf %194, %184 : vector<1x8xf32>
    %196 = arith.addf %172, %195 : vector<1x8xf32>
    %c8_34 = arith.constant 8 : index
    %197 = memref.load %arg0[%c8_34] : memref<40xf32, #tpu.memory_space<smem>>
    %198 = vector.broadcast %197 : f32 to vector<1x8xf32>
    %199 = arith.mulf %198, %0 : vector<1x8xf32>
    %c28 = arith.constant 28 : index
    %200 = memref.load %arg0[%c28] : memref<40xf32, #tpu.memory_space<smem>>
    %201 = vector.broadcast %200 : f32 to vector<1x8xf32>
    %202 = arith.mulf %201, %1 : vector<1x8xf32>
    %203 = arith.addf %199, %202 : vector<1x8xf32>
    %c8_35 = arith.constant 8 : index
    %204 = memref.load %arg1[%c8_35] : memref<20xf32, #tpu.memory_space<smem>>
    %205 = vector.broadcast %204 : f32 to vector<1x8xf32>
    %206 = arith.addf %203, %205 : vector<1x8xf32>
    %cst_36 = arith.constant 0.000000e+00 : f32
    %207 = vector.broadcast %cst_36 : f32 to vector<1x8xf32>
    %208 = arith.maximumf %206, %207 : vector<1x8xf32>
    %c24_37 = arith.constant 24 : index
    %209 = memref.load %arg2[%c24_37] : memref<60xf32, #tpu.memory_space<smem>>
    %210 = vector.broadcast %209 : f32 to vector<1x8xf32>
    %211 = arith.mulf %210, %208 : vector<1x8xf32>
    %212 = arith.addf %188, %211 : vector<1x8xf32>
    %c25_38 = arith.constant 25 : index
    %213 = memref.load %arg2[%c25_38] : memref<60xf32, #tpu.memory_space<smem>>
    %214 = vector.broadcast %213 : f32 to vector<1x8xf32>
    %215 = arith.mulf %214, %208 : vector<1x8xf32>
    %216 = arith.addf %192, %215 : vector<1x8xf32>
    %c26_39 = arith.constant 26 : index
    %217 = memref.load %arg2[%c26_39] : memref<60xf32, #tpu.memory_space<smem>>
    %218 = vector.broadcast %217 : f32 to vector<1x8xf32>
    %219 = arith.mulf %218, %208 : vector<1x8xf32>
    %220 = arith.addf %196, %219 : vector<1x8xf32>
    %c9_40 = arith.constant 9 : index
    %221 = memref.load %arg0[%c9_40] : memref<40xf32, #tpu.memory_space<smem>>
    %222 = vector.broadcast %221 : f32 to vector<1x8xf32>
    %223 = arith.mulf %222, %0 : vector<1x8xf32>
    %c29 = arith.constant 29 : index
    %224 = memref.load %arg0[%c29] : memref<40xf32, #tpu.memory_space<smem>>
    %225 = vector.broadcast %224 : f32 to vector<1x8xf32>
    %226 = arith.mulf %225, %1 : vector<1x8xf32>
    %227 = arith.addf %223, %226 : vector<1x8xf32>
    %c9_41 = arith.constant 9 : index
    %228 = memref.load %arg1[%c9_41] : memref<20xf32, #tpu.memory_space<smem>>
    %229 = vector.broadcast %228 : f32 to vector<1x8xf32>
    %230 = arith.addf %227, %229 : vector<1x8xf32>
    %cst_42 = arith.constant 0.000000e+00 : f32
    %231 = vector.broadcast %cst_42 : f32 to vector<1x8xf32>
    %232 = arith.maximumf %230, %231 : vector<1x8xf32>
    %c27_43 = arith.constant 27 : index
    %233 = memref.load %arg2[%c27_43] : memref<60xf32, #tpu.memory_space<smem>>
    %234 = vector.broadcast %233 : f32 to vector<1x8xf32>
    %235 = arith.mulf %234, %232 : vector<1x8xf32>
    %236 = arith.addf %212, %235 : vector<1x8xf32>
    %c28_44 = arith.constant 28 : index
    %237 = memref.load %arg2[%c28_44] : memref<60xf32, #tpu.memory_space<smem>>
    %238 = vector.broadcast %237 : f32 to vector<1x8xf32>
    %239 = arith.mulf %238, %232 : vector<1x8xf32>
    %240 = arith.addf %216, %239 : vector<1x8xf32>
    %c29_45 = arith.constant 29 : index
    %241 = memref.load %arg2[%c29_45] : memref<60xf32, #tpu.memory_space<smem>>
    %242 = vector.broadcast %241 : f32 to vector<1x8xf32>
    %243 = arith.mulf %242, %232 : vector<1x8xf32>
    %244 = arith.addf %220, %243 : vector<1x8xf32>
    %c10_46 = arith.constant 10 : index
    %245 = memref.load %arg0[%c10_46] : memref<40xf32, #tpu.memory_space<smem>>
    %246 = vector.broadcast %245 : f32 to vector<1x8xf32>
    %247 = arith.mulf %246, %0 : vector<1x8xf32>
    %c30 = arith.constant 30 : index
    %248 = memref.load %arg0[%c30] : memref<40xf32, #tpu.memory_space<smem>>
    %249 = vector.broadcast %248 : f32 to vector<1x8xf32>
    %250 = arith.mulf %249, %1 : vector<1x8xf32>
    %251 = arith.addf %247, %250 : vector<1x8xf32>
    %c10_47 = arith.constant 10 : index
    %252 = memref.load %arg1[%c10_47] : memref<20xf32, #tpu.memory_space<smem>>
    %253 = vector.broadcast %252 : f32 to vector<1x8xf32>
    %254 = arith.addf %251, %253 : vector<1x8xf32>
    %cst_48 = arith.constant 0.000000e+00 : f32
    %255 = vector.broadcast %cst_48 : f32 to vector<1x8xf32>
    %256 = arith.maximumf %254, %255 : vector<1x8xf32>
    %c30_49 = arith.constant 30 : index
    %257 = memref.load %arg2[%c30_49] : memref<60xf32, #tpu.memory_space<smem>>
    %258 = vector.broadcast %257 : f32 to vector<1x8xf32>
    %259 = arith.mulf %258, %256 : vector<1x8xf32>
    %260 = arith.addf %236, %259 : vector<1x8xf32>
    %c31 = arith.constant 31 : index
    %261 = memref.load %arg2[%c31] : memref<60xf32, #tpu.memory_space<smem>>
    %262 = vector.broadcast %261 : f32 to vector<1x8xf32>
    %263 = arith.mulf %262, %256 : vector<1x8xf32>
    %264 = arith.addf %240, %263 : vector<1x8xf32>
    %c32 = arith.constant 32 : index
    %265 = memref.load %arg2[%c32] : memref<60xf32, #tpu.memory_space<smem>>
    %266 = vector.broadcast %265 : f32 to vector<1x8xf32>
    %267 = arith.mulf %266, %256 : vector<1x8xf32>
    %268 = arith.addf %244, %267 : vector<1x8xf32>
    %c11_50 = arith.constant 11 : index
    %269 = memref.load %arg0[%c11_50] : memref<40xf32, #tpu.memory_space<smem>>
    %270 = vector.broadcast %269 : f32 to vector<1x8xf32>
    %271 = arith.mulf %270, %0 : vector<1x8xf32>
    %c31_51 = arith.constant 31 : index
    %272 = memref.load %arg0[%c31_51] : memref<40xf32, #tpu.memory_space<smem>>
    %273 = vector.broadcast %272 : f32 to vector<1x8xf32>
    %274 = arith.mulf %273, %1 : vector<1x8xf32>
    %275 = arith.addf %271, %274 : vector<1x8xf32>
    %c11_52 = arith.constant 11 : index
    %276 = memref.load %arg1[%c11_52] : memref<20xf32, #tpu.memory_space<smem>>
    %277 = vector.broadcast %276 : f32 to vector<1x8xf32>
    %278 = arith.addf %275, %277 : vector<1x8xf32>
    %cst_53 = arith.constant 0.000000e+00 : f32
    %279 = vector.broadcast %cst_53 : f32 to vector<1x8xf32>
    %280 = arith.maximumf %278, %279 : vector<1x8xf32>
    %c33 = arith.constant 33 : index
    %281 = memref.load %arg2[%c33] : memref<60xf32, #tpu.memory_space<smem>>
    %282 = vector.broadcast %281 : f32 to vector<1x8xf32>
    %283 = arith.mulf %282, %280 : vector<1x8xf32>
    %284 = arith.addf %260, %283 : vector<1x8xf32>
    %c34 = arith.constant 34 : index
    %285 = memref.load %arg2[%c34] : memref<60xf32, #tpu.memory_space<smem>>
    %286 = vector.broadcast %285 : f32 to vector<1x8xf32>
    %287 = arith.mulf %286, %280 : vector<1x8xf32>
    %288 = arith.addf %264, %287 : vector<1x8xf32>
    %c35 = arith.constant 35 : index
    %289 = memref.load %arg2[%c35] : memref<60xf32, #tpu.memory_space<smem>>
    %290 = vector.broadcast %289 : f32 to vector<1x8xf32>
    %291 = arith.mulf %290, %280 : vector<1x8xf32>
    %292 = arith.addf %268, %291 : vector<1x8xf32>
    %c12_54 = arith.constant 12 : index
    %293 = memref.load %arg0[%c12_54] : memref<40xf32, #tpu.memory_space<smem>>
    %294 = vector.broadcast %293 : f32 to vector<1x8xf32>
    %295 = arith.mulf %294, %0 : vector<1x8xf32>
    %c32_55 = arith.constant 32 : index
    %296 = memref.load %arg0[%c32_55] : memref<40xf32, #tpu.memory_space<smem>>
    %297 = vector.broadcast %296 : f32 to vector<1x8xf32>
    %298 = arith.mulf %297, %1 : vector<1x8xf32>
    %299 = arith.addf %295, %298 : vector<1x8xf32>
    %c12_56 = arith.constant 12 : index
    %300 = memref.load %arg1[%c12_56] : memref<20xf32, #tpu.memory_space<smem>>
    %301 = vector.broadcast %300 : f32 to vector<1x8xf32>
    %302 = arith.addf %299, %301 : vector<1x8xf32>
    %cst_57 = arith.constant 0.000000e+00 : f32
    %303 = vector.broadcast %cst_57 : f32 to vector<1x8xf32>
    %304 = arith.maximumf %302, %303 : vector<1x8xf32>
    %c36 = arith.constant 36 : index
    %305 = memref.load %arg2[%c36] : memref<60xf32, #tpu.memory_space<smem>>
    %306 = vector.broadcast %305 : f32 to vector<1x8xf32>
    %307 = arith.mulf %306, %304 : vector<1x8xf32>
    %308 = arith.addf %284, %307 : vector<1x8xf32>
    %c37 = arith.constant 37 : index
    %309 = memref.load %arg2[%c37] : memref<60xf32, #tpu.memory_space<smem>>
    %310 = vector.broadcast %309 : f32 to vector<1x8xf32>
    %311 = arith.mulf %310, %304 : vector<1x8xf32>
    %312 = arith.addf %288, %311 : vector<1x8xf32>
    %c38 = arith.constant 38 : index
    %313 = memref.load %arg2[%c38] : memref<60xf32, #tpu.memory_space<smem>>
    %314 = vector.broadcast %313 : f32 to vector<1x8xf32>
    %315 = arith.mulf %314, %304 : vector<1x8xf32>
    %316 = arith.addf %292, %315 : vector<1x8xf32>
    %c13_58 = arith.constant 13 : index
    %317 = memref.load %arg0[%c13_58] : memref<40xf32, #tpu.memory_space<smem>>
    %318 = vector.broadcast %317 : f32 to vector<1x8xf32>
    %319 = arith.mulf %318, %0 : vector<1x8xf32>
    %c33_59 = arith.constant 33 : index
    %320 = memref.load %arg0[%c33_59] : memref<40xf32, #tpu.memory_space<smem>>
    %321 = vector.broadcast %320 : f32 to vector<1x8xf32>
    %322 = arith.mulf %321, %1 : vector<1x8xf32>
    %323 = arith.addf %319, %322 : vector<1x8xf32>
    %c13_60 = arith.constant 13 : index
    %324 = memref.load %arg1[%c13_60] : memref<20xf32, #tpu.memory_space<smem>>
    %325 = vector.broadcast %324 : f32 to vector<1x8xf32>
    %326 = arith.addf %323, %325 : vector<1x8xf32>
    %cst_61 = arith.constant 0.000000e+00 : f32
    %327 = vector.broadcast %cst_61 : f32 to vector<1x8xf32>
    %328 = arith.maximumf %326, %327 : vector<1x8xf32>
    %c39 = arith.constant 39 : index
    %329 = memref.load %arg2[%c39] : memref<60xf32, #tpu.memory_space<smem>>
    %330 = vector.broadcast %329 : f32 to vector<1x8xf32>
    %331 = arith.mulf %330, %328 : vector<1x8xf32>
    %332 = arith.addf %308, %331 : vector<1x8xf32>
    %c40 = arith.constant 40 : index
    %333 = memref.load %arg2[%c40] : memref<60xf32, #tpu.memory_space<smem>>
    %334 = vector.broadcast %333 : f32 to vector<1x8xf32>
    %335 = arith.mulf %334, %328 : vector<1x8xf32>
    %336 = arith.addf %312, %335 : vector<1x8xf32>
    %c41 = arith.constant 41 : index
    %337 = memref.load %arg2[%c41] : memref<60xf32, #tpu.memory_space<smem>>
    %338 = vector.broadcast %337 : f32 to vector<1x8xf32>
    %339 = arith.mulf %338, %328 : vector<1x8xf32>
    %340 = arith.addf %316, %339 : vector<1x8xf32>
    %c14_62 = arith.constant 14 : index
    %341 = memref.load %arg0[%c14_62] : memref<40xf32, #tpu.memory_space<smem>>
    %342 = vector.broadcast %341 : f32 to vector<1x8xf32>
    %343 = arith.mulf %342, %0 : vector<1x8xf32>
    %c34_63 = arith.constant 34 : index
    %344 = memref.load %arg0[%c34_63] : memref<40xf32, #tpu.memory_space<smem>>
    %345 = vector.broadcast %344 : f32 to vector<1x8xf32>
    %346 = arith.mulf %345, %1 : vector<1x8xf32>
    %347 = arith.addf %343, %346 : vector<1x8xf32>
    %c14_64 = arith.constant 14 : index
    %348 = memref.load %arg1[%c14_64] : memref<20xf32, #tpu.memory_space<smem>>
    %349 = vector.broadcast %348 : f32 to vector<1x8xf32>
    %350 = arith.addf %347, %349 : vector<1x8xf32>
    %cst_65 = arith.constant 0.000000e+00 : f32
    %351 = vector.broadcast %cst_65 : f32 to vector<1x8xf32>
    %352 = arith.maximumf %350, %351 : vector<1x8xf32>
    %c42 = arith.constant 42 : index
    %353 = memref.load %arg2[%c42] : memref<60xf32, #tpu.memory_space<smem>>
    %354 = vector.broadcast %353 : f32 to vector<1x8xf32>
    %355 = arith.mulf %354, %352 : vector<1x8xf32>
    %356 = arith.addf %332, %355 : vector<1x8xf32>
    %c43 = arith.constant 43 : index
    %357 = memref.load %arg2[%c43] : memref<60xf32, #tpu.memory_space<smem>>
    %358 = vector.broadcast %357 : f32 to vector<1x8xf32>
    %359 = arith.mulf %358, %352 : vector<1x8xf32>
    %360 = arith.addf %336, %359 : vector<1x8xf32>
    %c44 = arith.constant 44 : index
    %361 = memref.load %arg2[%c44] : memref<60xf32, #tpu.memory_space<smem>>
    %362 = vector.broadcast %361 : f32 to vector<1x8xf32>
    %363 = arith.mulf %362, %352 : vector<1x8xf32>
    %364 = arith.addf %340, %363 : vector<1x8xf32>
    %c15_66 = arith.constant 15 : index
    %365 = memref.load %arg0[%c15_66] : memref<40xf32, #tpu.memory_space<smem>>
    %366 = vector.broadcast %365 : f32 to vector<1x8xf32>
    %367 = arith.mulf %366, %0 : vector<1x8xf32>
    %c35_67 = arith.constant 35 : index
    %368 = memref.load %arg0[%c35_67] : memref<40xf32, #tpu.memory_space<smem>>
    %369 = vector.broadcast %368 : f32 to vector<1x8xf32>
    %370 = arith.mulf %369, %1 : vector<1x8xf32>
    %371 = arith.addf %367, %370 : vector<1x8xf32>
    %c15_68 = arith.constant 15 : index
    %372 = memref.load %arg1[%c15_68] : memref<20xf32, #tpu.memory_space<smem>>
    %373 = vector.broadcast %372 : f32 to vector<1x8xf32>
    %374 = arith.addf %371, %373 : vector<1x8xf32>
    %cst_69 = arith.constant 0.000000e+00 : f32
    %375 = vector.broadcast %cst_69 : f32 to vector<1x8xf32>
    %376 = arith.maximumf %374, %375 : vector<1x8xf32>
    %c45 = arith.constant 45 : index
    %377 = memref.load %arg2[%c45] : memref<60xf32, #tpu.memory_space<smem>>
    %378 = vector.broadcast %377 : f32 to vector<1x8xf32>
    %379 = arith.mulf %378, %376 : vector<1x8xf32>
    %380 = arith.addf %356, %379 : vector<1x8xf32>
    %c46 = arith.constant 46 : index
    %381 = memref.load %arg2[%c46] : memref<60xf32, #tpu.memory_space<smem>>
    %382 = vector.broadcast %381 : f32 to vector<1x8xf32>
    %383 = arith.mulf %382, %376 : vector<1x8xf32>
    %384 = arith.addf %360, %383 : vector<1x8xf32>
    %c47 = arith.constant 47 : index
    %385 = memref.load %arg2[%c47] : memref<60xf32, #tpu.memory_space<smem>>
    %386 = vector.broadcast %385 : f32 to vector<1x8xf32>
    %387 = arith.mulf %386, %376 : vector<1x8xf32>
    %388 = arith.addf %364, %387 : vector<1x8xf32>
    %c16_70 = arith.constant 16 : index
    %389 = memref.load %arg0[%c16_70] : memref<40xf32, #tpu.memory_space<smem>>
    %390 = vector.broadcast %389 : f32 to vector<1x8xf32>
    %391 = arith.mulf %390, %0 : vector<1x8xf32>
    %c36_71 = arith.constant 36 : index
    %392 = memref.load %arg0[%c36_71] : memref<40xf32, #tpu.memory_space<smem>>
    %393 = vector.broadcast %392 : f32 to vector<1x8xf32>
    %394 = arith.mulf %393, %1 : vector<1x8xf32>
    %395 = arith.addf %391, %394 : vector<1x8xf32>
    %c16_72 = arith.constant 16 : index
    %396 = memref.load %arg1[%c16_72] : memref<20xf32, #tpu.memory_space<smem>>
    %397 = vector.broadcast %396 : f32 to vector<1x8xf32>
    %398 = arith.addf %395, %397 : vector<1x8xf32>
    %cst_73 = arith.constant 0.000000e+00 : f32
    %399 = vector.broadcast %cst_73 : f32 to vector<1x8xf32>
    %400 = arith.maximumf %398, %399 : vector<1x8xf32>
    %c48 = arith.constant 48 : index
    %401 = memref.load %arg2[%c48] : memref<60xf32, #tpu.memory_space<smem>>
    %402 = vector.broadcast %401 : f32 to vector<1x8xf32>
    %403 = arith.mulf %402, %400 : vector<1x8xf32>
    %404 = arith.addf %380, %403 : vector<1x8xf32>
    %c49 = arith.constant 49 : index
    %405 = memref.load %arg2[%c49] : memref<60xf32, #tpu.memory_space<smem>>
    %406 = vector.broadcast %405 : f32 to vector<1x8xf32>
    %407 = arith.mulf %406, %400 : vector<1x8xf32>
    %408 = arith.addf %384, %407 : vector<1x8xf32>
    %c50 = arith.constant 50 : index
    %409 = memref.load %arg2[%c50] : memref<60xf32, #tpu.memory_space<smem>>
    %410 = vector.broadcast %409 : f32 to vector<1x8xf32>
    %411 = arith.mulf %410, %400 : vector<1x8xf32>
    %412 = arith.addf %388, %411 : vector<1x8xf32>
    %c17_74 = arith.constant 17 : index
    %413 = memref.load %arg0[%c17_74] : memref<40xf32, #tpu.memory_space<smem>>
    %414 = vector.broadcast %413 : f32 to vector<1x8xf32>
    %415 = arith.mulf %414, %0 : vector<1x8xf32>
    %c37_75 = arith.constant 37 : index
    %416 = memref.load %arg0[%c37_75] : memref<40xf32, #tpu.memory_space<smem>>
    %417 = vector.broadcast %416 : f32 to vector<1x8xf32>
    %418 = arith.mulf %417, %1 : vector<1x8xf32>
    %419 = arith.addf %415, %418 : vector<1x8xf32>
    %c17_76 = arith.constant 17 : index
    %420 = memref.load %arg1[%c17_76] : memref<20xf32, #tpu.memory_space<smem>>
    %421 = vector.broadcast %420 : f32 to vector<1x8xf32>
    %422 = arith.addf %419, %421 : vector<1x8xf32>
    %cst_77 = arith.constant 0.000000e+00 : f32
    %423 = vector.broadcast %cst_77 : f32 to vector<1x8xf32>
    %424 = arith.maximumf %422, %423 : vector<1x8xf32>
    %c51 = arith.constant 51 : index
    %425 = memref.load %arg2[%c51] : memref<60xf32, #tpu.memory_space<smem>>
    %426 = vector.broadcast %425 : f32 to vector<1x8xf32>
    %427 = arith.mulf %426, %424 : vector<1x8xf32>
    %428 = arith.addf %404, %427 : vector<1x8xf32>
    %c52 = arith.constant 52 : index
    %429 = memref.load %arg2[%c52] : memref<60xf32, #tpu.memory_space<smem>>
    %430 = vector.broadcast %429 : f32 to vector<1x8xf32>
    %431 = arith.mulf %430, %424 : vector<1x8xf32>
    %432 = arith.addf %408, %431 : vector<1x8xf32>
    %c53 = arith.constant 53 : index
    %433 = memref.load %arg2[%c53] : memref<60xf32, #tpu.memory_space<smem>>
    %434 = vector.broadcast %433 : f32 to vector<1x8xf32>
    %435 = arith.mulf %434, %424 : vector<1x8xf32>
    %436 = arith.addf %412, %435 : vector<1x8xf32>
    %c18_78 = arith.constant 18 : index
    %437 = memref.load %arg0[%c18_78] : memref<40xf32, #tpu.memory_space<smem>>
    %438 = vector.broadcast %437 : f32 to vector<1x8xf32>
    %439 = arith.mulf %438, %0 : vector<1x8xf32>
    %c38_79 = arith.constant 38 : index
    %440 = memref.load %arg0[%c38_79] : memref<40xf32, #tpu.memory_space<smem>>
    %441 = vector.broadcast %440 : f32 to vector<1x8xf32>
    %442 = arith.mulf %441, %1 : vector<1x8xf32>
    %443 = arith.addf %439, %442 : vector<1x8xf32>
    %c18_80 = arith.constant 18 : index
    %444 = memref.load %arg1[%c18_80] : memref<20xf32, #tpu.memory_space<smem>>
    %445 = vector.broadcast %444 : f32 to vector<1x8xf32>
    %446 = arith.addf %443, %445 : vector<1x8xf32>
    %cst_81 = arith.constant 0.000000e+00 : f32
    %447 = vector.broadcast %cst_81 : f32 to vector<1x8xf32>
    %448 = arith.maximumf %446, %447 : vector<1x8xf32>
    %c54 = arith.constant 54 : index
    %449 = memref.load %arg2[%c54] : memref<60xf32, #tpu.memory_space<smem>>
    %450 = vector.broadcast %449 : f32 to vector<1x8xf32>
    %451 = arith.mulf %450, %448 : vector<1x8xf32>
    %452 = arith.addf %428, %451 : vector<1x8xf32>
    %c55 = arith.constant 55 : index
    %453 = memref.load %arg2[%c55] : memref<60xf32, #tpu.memory_space<smem>>
    %454 = vector.broadcast %453 : f32 to vector<1x8xf32>
    %455 = arith.mulf %454, %448 : vector<1x8xf32>
    %456 = arith.addf %432, %455 : vector<1x8xf32>
    %c56 = arith.constant 56 : index
    %457 = memref.load %arg2[%c56] : memref<60xf32, #tpu.memory_space<smem>>
    %458 = vector.broadcast %457 : f32 to vector<1x8xf32>
    %459 = arith.mulf %458, %448 : vector<1x8xf32>
    %460 = arith.addf %436, %459 : vector<1x8xf32>
    %c19_82 = arith.constant 19 : index
    %461 = memref.load %arg0[%c19_82] : memref<40xf32, #tpu.memory_space<smem>>
    %462 = vector.broadcast %461 : f32 to vector<1x8xf32>
    %463 = arith.mulf %462, %0 : vector<1x8xf32>
    %c39_83 = arith.constant 39 : index
    %464 = memref.load %arg0[%c39_83] : memref<40xf32, #tpu.memory_space<smem>>
    %465 = vector.broadcast %464 : f32 to vector<1x8xf32>
    %466 = arith.mulf %465, %1 : vector<1x8xf32>
    %467 = arith.addf %463, %466 : vector<1x8xf32>
    %c19_84 = arith.constant 19 : index
    %468 = memref.load %arg1[%c19_84] : memref<20xf32, #tpu.memory_space<smem>>
    %469 = vector.broadcast %468 : f32 to vector<1x8xf32>
    %470 = arith.addf %467, %469 : vector<1x8xf32>
    %cst_85 = arith.constant 0.000000e+00 : f32
    %471 = vector.broadcast %cst_85 : f32 to vector<1x8xf32>
    %472 = arith.maximumf %470, %471 : vector<1x8xf32>
    %c57 = arith.constant 57 : index
    %473 = memref.load %arg2[%c57] : memref<60xf32, #tpu.memory_space<smem>>
    %474 = vector.broadcast %473 : f32 to vector<1x8xf32>
    %475 = arith.mulf %474, %472 : vector<1x8xf32>
    %476 = arith.addf %452, %475 : vector<1x8xf32>
    %c58 = arith.constant 58 : index
    %477 = memref.load %arg2[%c58] : memref<60xf32, #tpu.memory_space<smem>>
    %478 = vector.broadcast %477 : f32 to vector<1x8xf32>
    %479 = arith.mulf %478, %472 : vector<1x8xf32>
    %480 = arith.addf %456, %479 : vector<1x8xf32>
    %c59 = arith.constant 59 : index
    %481 = memref.load %arg2[%c59] : memref<60xf32, #tpu.memory_space<smem>>
    %482 = vector.broadcast %481 : f32 to vector<1x8xf32>
    %483 = arith.mulf %482, %472 : vector<1x8xf32>
    %484 = arith.addf %460, %483 : vector<1x8xf32>
    %c0_86 = arith.constant 0 : index
    %485 = memref.load %arg3[%c0_86] : memref<3xf32, #tpu.memory_space<smem>>
    %486 = vector.broadcast %485 : f32 to vector<1x8xf32>
    %487 = arith.addf %476, %486 : vector<1x8xf32>
    %c0_87 = arith.constant 0 : index
    %c0_88 = arith.constant 0 : index
    %488 = vector.load %arg5[%c0_87, %c0_88] : memref<3x8xf32, #tpu.memory_space<vmem>>, vector<1x8xf32>
    tpu.vector_store %arg5[%c0_87, %c0_88], %487 {strides = array<i32>} : memref<3x8xf32, #tpu.memory_space<vmem>>, vector<1x8xf32>,
    %c1_89 = arith.constant 1 : index
    %489 = memref.load %arg3[%c1_89] : memref<3xf32, #tpu.memory_space<smem>>
    %490 = vector.broadcast %489 : f32 to vector<1x8xf32>
    %491 = arith.addf %480, %490 : vector<1x8xf32>
    %c1_90 = arith.constant 1 : index
    %c0_91 = arith.constant 0 : index
    %492 = vector.load %arg5[%c1_90, %c0_91] : memref<3x8xf32, #tpu.memory_space<vmem>>, vector<1x8xf32>
    tpu.vector_store %arg5[%c1_90, %c0_91], %491 {strides = array<i32>} : memref<3x8xf32, #tpu.memory_space<vmem>>, vector<1x8xf32>,
    %c2_92 = arith.constant 2 : index
    %493 = memref.load %arg3[%c2_92] : memref<3xf32, #tpu.memory_space<smem>>
    %494 = vector.broadcast %493 : f32 to vector<1x8xf32>
    %495 = arith.addf %484, %494 : vector<1x8xf32>
    %c2_93 = arith.constant 2 : index
    %c0_94 = arith.constant 0 : index
    %496 = vector.load %arg5[%c2_93, %c0_94] : memref<3x8xf32, #tpu.memory_space<vmem>>, vector<1x8xf32>
    tpu.vector_store %arg5[%c2_93, %c0_94], %495 {strides = array<i32>} : memref<3x8xf32, #tpu.memory_space<vmem>>, vector<1x8xf32>,
    return
  }
}

</mosaic_0001>

<bundles_post_ra>
// kernel: tpu_custom_call.1
= control target key start
LH: loop header
LB: loop body
LE: loop exit
PB: predicated region body
PF: predicated region fallthrough
CT: control target
= control target key end

     0   :  { %10 = vsyncpa [#allocation4], 0  ;;  %s1225_s0 = inlined_call_operand.hbm [shape: f32[40], index: 0, kind: input, shape index: {}]   ;;  %s1226_s1 = inlined_call_operand.vmem [shape: f32[20], index: 1, kind: input, shape index: {}]   ;;  %s1227_s2 = inlined_call_operand.vmem [shape: f32[60], index: 2, kind: input, shape index: {}]   ;;  %s1228_s3 = inlined_call_operand.vmem [shape: f32[3], index: 3, kind: input, shape index: {}]   ;;  %s1229_s4 = inlined_call_operand.vmem [shape: f32[2,8], index: 4, kind: input, shape index: {}]   ;;  %s1230_s5 = inlined_call_operand.hbm [shape: f32[3,8], index: 5, kind: output, shape index: {}]  }
   0x1   :  { %11 = vsyncpa [#allocation5], 0 }
   0x2   :  { %12 = vsyncpa [#allocation8], 0  ;;  %s38_s20 = sshll.u32 %s1227_s2, 4  ;;  %s39_s20 = int_to_ptr.vmem [resolvable:$true] %s38_s20 }
   0x3   :  { %13 = vsyncpa [#allocation3], 0  ;;  %s683_s21 = scalar_lea.vmem %s39_s20, 16  ;;  %p688_p1 = scmp.lt.s32.totalorder %s39_s20, %s39_s20 }
   0x4   :  { %p684_p0 = scmp.ne.s32.totalorder %s39_s20, %s683_s21  ;;  %p689_p2 = scmp.lt.s32.totalorder %s683_s21, %s683_s21 }
   0x6   :  { %p690_p3 = por %p689_p2, %p688_p1 }
   0x8   :  { %p691_p4 = pnand %p690_p3, %p684_p0 }
   0xa   :  { %694 = shalt.err (!%p691_p4)
}
   0xb   :  { %s759_s22 = smov [#allocation7]   ;;  %s695_s25 = scalar_lea.hbm %s1225_s0, 16 }
   0xc   :  { %41 = dma.vmem_to_smem %s39_s20, 16, %s759_s22, [#allocation8]  }
   0xd   :  { %p696_p5 = scmp.ne.s32.totalorder %s1225_s0, %s695_s25  ;;  %p699_p6 = scmp.lt.u32.totalorder %s695_s25, %s1225_s0 }
   0xf   :  { %p701_p7 = pnand %p699_p6, %p696_p5 }
  0x11   :  { %704 = shalt.err (!%p701_p7)
}
  0x12   :  { %s760_s29 = smov [#allocation2]   ;;  %s28_s9 = sshll.u32 %s1226_s1, 4  ;;  %s29_s9 = int_to_ptr.vmem [resolvable:$true] %s28_s9 }
  0x13   :  { %21 = dma.hbm_to_smem %s1225_s0, 16, %s760_s29, [#allocation4]  }
  0x14   :  { %s48_s12 = sshll.u32 %s1228_s3, 4  ;;  %s705_s13 = scalar_lea.vmem %s29_s9, 16  ;;  %s49_s12 = int_to_ptr.vmem [resolvable:$true] %s48_s12 }
  0x15   :  { %p706_p8 = scmp.ne.s32.totalorder %s29_s9, %s705_s13  ;;  %p710_p9 = scmp.lt.s32.totalorder %s29_s9, %s29_s9 }
  0x16   :  { %p711_p10 = scmp.lt.s32.totalorder %s705_s13, %s705_s13 }
  0x18   :  { %p712_p11 = por %p711_p10, %p710_p9 }
  0x1a   :  { %p713_p12 = pnand %p712_p11, %p706_p8 }
  0x1c   :  { %716 = shalt.err (!%p713_p12)
}
  0x1d   :  { %s761_s14 = smov [#allocation6]   ;;  %s717_s0 = scalar_lea.vmem %s49_s12, 16 }
  0x1e   :  { %31 = dma.vmem_to_smem %s29_s9, 16, %s761_s14, [#allocation5]  }
  0x1f   :  { %p718_p13 = scmp.ne.s32.totalorder %s49_s12, %s717_s0  ;;  %p722_p0 = scmp.lt.s32.totalorder %s49_s12, %s49_s12 }
  0x20   :  { %p723_p1 = scmp.lt.s32.totalorder %s717_s0, %s717_s0 }
  0x22   :  { %p724_p2 = por %p723_p1, %p722_p0 }
  0x24   :  { %p725_p3 = pnand %p724_p2, %p718_p13 }
  0x26   :  { %728 = shalt.err (!%p725_p3)
}
  0x27   :  { %s762_s1 = smov [#allocation9]  }
  0x28   :  { %51 = dma.vmem_to_smem %s49_s12, 16, %s762_s1, [#allocation8]  }
  0x29   :  { %751 = dma.done.wait [#allocation4], 16  }
  0x2a   :  { %752 = vsyncadd [#allocation4], 4294967280 }
  0x2b   :  { %753 = dma.done.wait [#allocation5], 16  }
  0x2c   :  { %754 = vsyncadd [#allocation5], 4294967280 }
  0x2d   :  { %755 = dma.done.wait [#allocation8], 32  }
  0x2e   :  { %756 = vsyncadd [#allocation8], 4294967264 }
  0x2f   :  { %66 = sfence }
  0x30   :  { %s69_s3 = sld [smem:[#allocation2]]  ;;  %s559_s15 = sld [smem:[#allocation2 + $0x14]]  ;;  %v826_v0 = vld [vmem:[%s1229_s4] sm:$0x1]  ;;  %v833_v1 = vld [vmem:[%s1229_s4 + $0x1] sm:$0x1] }
  0x31   :  { %s815_s16 = sld [smem:[#allocation6]]  ;;  %s819_s18 = sld [smem:[#allocation7 + $0x1]]  ;;  %vm532_vm0 = vcmask 57344  }
  0x32   :  { %s817_s17 = sld [smem:[#allocation7]]  ;;  %s821_s19 = sld [smem:[#allocation7 + $0x2]] }
  0x33   :  { %s562_s20 = sld [smem:[#allocation2 + $0x1]]  ;;  %s563_s23 = sld [smem:[#allocation2 + $0x15]] }
  0x34   :  { %s828_s24 = sld [smem:[#allocation6 + $0x1]]  ;;  %s835_s27 = sld [smem:[#allocation7 + $0x3]] }
  0x35   :  { %s837_s2 = sld [smem:[#allocation7 + $0x4]]  ;;  %s839_s28 = sld [smem:[#allocation7 + $0x5]] }
  0x36   :  { %v70_v2 = vstv %s69_s3  ;;  %s568_s29 = sld [smem:[#allocation2 + $0x2]]  ;;  %v73_v4 = vstv %s559_s15  ;;  %s842_s30 = sld [smem:[#allocation2 + $0x16]] }
  0x37   :  { %v71_v3 = vmul.f32 %v70_v2, %v826_v0  ;;  %s844_s6 = sld [smem:[#allocation6 + $0x2]]  ;;  %v74_v5 = vmul.f32 %v73_v4, %v833_v1  ;;  %s847_s4 = sld [smem:[#allocation7 + $0x6]]  ;;  %v77_v6 = vstv %s815_s16  ;;  %v85_v12 = vstv %s819_s18 }
  0x38   :  { %s849_s7 = sld [smem:[#allocation7 + $0x7]]  ;;  %s852_s8 = sld [smem:[#allocation7 + $0x8]]  ;;  %v81_v11 = vstv %s817_s17  ;;  %v89_v15 = vstv %s821_s19 }
  0x39   :  { %v93_v7 = vstv %s562_s20  ;;  %s854_s9 = sld [smem:[#allocation2 + $0x3]]  ;;  %v75_v8 = vadd.f32 %v74_v5, %v71_v3  ;;  %v96_v10 = vstv %s563_s23  ;;  %s857_s10 = sld [smem:[#allocation2 + $0x17]] }
  0x3a   :  { %v94_v9 = vmul.f32 %v93_v7, %v826_v0  ;;  %s859_s11 = sld [smem:[#allocation6 + $0x3]]  ;;  %v97_v13 = vmul.f32 %v96_v10, %v833_v1  ;;  %s864_s12 = sld [smem:[#allocation7 + $0x9]]  ;;  %v100_v16 = vstv %s828_s24  ;;  %v104_v19 = vstv %s835_s27 }
  0x3b   :  { %v78_v14 = vadd.f32 %v77_v6, %v75_v8  ;;  %s868_s13 = sld [smem:[#allocation2 + $0x4]]  ;;  %s873_s14 = sld [smem:[#allocation2 + $0x18]]  ;;  %v108_v23 = vstv %s837_s2  ;;  %v112_v24 = vstv %s839_s28 }
  0x3c   :  { %v116_v17 = vstv %s568_s29  ;;  %v98_v18 = vadd.f32 %v97_v13, %v94_v9  ;;  %v119_v21 = vstv %s842_s30  ;;  %s878_s0 = sld [smem:[#allocation7 + $0xa]]  ;;  %s883_s1 = sld [smem:[#allocation7 + $0xb]] }
  0x3d   :  { %v117_v20 = vmul.f32 %v116_v17, %v826_v0  ;;  %v79_v22 = vmax.f32 %v78_v14, 0.0  ;;  %v120_v25 = vmul.f32 %v119_v21, %v833_v1  ;;  %v123_v27 = vstv %s844_s6  ;;  %s885_s3 = sld [smem:[#allocation6 + $0x4]]  ;;  %s892_s16 = sld [smem:[#allocation2 + $0x5]] }
  0x3e   :  { %v101_v26 = vadd.f32 %v100_v16, %v98_v18  ;;  %v127_v28 = vstv %s847_s4  ;;  %v131_v33 = vstv %s849_s7  ;;  %s888_s15 = sld [smem:[#allocation7 + $0xc]]  ;;  %s894_s17 = sld [smem:[#allocation2 + $0x19]]  ;;  %v135_v39 = vstv %s852_s8 }
  0x3f   :  { %v139_v29 = vstv %s854_s9  ;;  %v82_v30 = vmul.f32 %v81_v11, %v79_v22  ;;  %v86_v31 = vmul.f32 %v85_v12, %v79_v22  ;;  %v121_v32 = vadd.f32 %v120_v25, %v117_v20  ;;  %s900_s18 = sld [smem:[#allocation7 + $0xd]]  ;;  %s902_s19 = sld [smem:[#allocation7 + $0xe]] }
  0x40   :  { %v90_v34 = vmul.f32 %v89_v15, %v79_v22  ;;  %v102_v35 = vmax.f32 %v101_v26, 0.0  ;;  %v140_v36 = vmul.f32 %v139_v29, %v826_v0  ;;  %v142_v37 = vstv %s857_s10  ;;  %s906_s20 = sld [smem:[#allocation6 + $0x5]]  ;;  %s908_s21 = sld [smem:[#allocation7 + $0xf]] }
  0x41   :  { %v124_v38 = vadd.f32 %v123_v27, %v121_v32  ;;  %v143_v40 = vmul.f32 %v142_v37, %v833_v1  ;;  %v146_v41 = vstv %s859_s11  ;;  %v150_v45 = vstv %s864_s12  ;;  %s911_s22 = sld [smem:[#allocation7 + $0x10]]  ;;  %s913_s23 = sld [smem:[#allocation2 + $0x6]] }
  0x42   :  { %v105_v42 = vmul.f32 %v104_v19, %v102_v35  ;;  %v109_v43 = vmul.f32 %v108_v23, %v102_v35  ;;  %v113_v44 = vmul.f32 %v112_v24, %v102_v35  ;;  %v162_v48 = vstv %s868_s13  ;;  %s915_s24 = sld [smem:[#allocation7 + $0x11]]  ;;  %s917_s25 = sld [smem:[#allocation2 + $0x1a]] }
  0x43   :  { %v125_v46 = vmax.f32 %v124_v38, 0.0  ;;  %v144_v47 = vadd.f32 %v143_v40, %v140_v36  ;;  %v165_v49 = vstv %s873_s14  ;;  %v163_v53 = vmul.f32 %v162_v48, %v826_v0  ;;  %s923_s26 = sld [smem:[#allocation6 + $0x6]]  ;;  %s926_s27 = sld [smem:[#allocation7 + $0x12]] }
  0x44   :  { %v106_v50 = vadd.f32 %v105_v42, %v82_v30  ;;  %v110_v51 = vadd.f32 %v109_v43, %v86_v31  ;;  %v114_v52 = vadd.f32 %v113_v44, %v90_v34  ;;  %v154_v58 = vstv %s878_s0  ;;  %s928_s2 = sld [smem:[#allocation2 + $0x7]]  ;;  %s932_s28 = sld [smem:[#allocation7 + $0x13]] }
  0x45   :  { %v128_v54 = vmul.f32 %v127_v28, %v125_v46  ;;  %v132_v55 = vmul.f32 %v131_v33, %v125_v46  ;;  %v136_v56 = vmul.f32 %v135_v39, %v125_v46  ;;  %v147_v57 = vadd.f32 %v146_v41, %v144_v47  ;;  %s935_s29 = sld [smem:[#allocation2 + $0x1b]]  ;;  %s940_s30 = sld [smem:[#allocation7 + $0x14]] }
  0x46   :  { %v158_v59 = vstv %s883_s1  ;;  %v166_v60 = vmul.f32 %v165_v49, %v833_v1  ;;  %v169_v61 = vstv %s885_s3  ;;  %v173_v3 = vstv %s888_s15  ;;  %s944_s6 = sld [smem:[#allocation6 + $0x7]]  ;;  %s946_s4 = sld [smem:[#allocation7 + $0x15]] }
  0x47   :  { %v129_v62 = vadd.f32 %v128_v54, %v106_v50  ;;  %v133_v63 = vadd.f32 %v132_v55, %v110_v51  ;;  %v148_v2 = vmax.f32 %v147_v57, 0.0  ;;  %v137_v4 = vadd.f32 %v136_v56, %v114_v52  ;;  %s949_s7 = sld [smem:[#allocation7 + $0x16]]  ;;  %s955_s8 = sld [smem:[#allocation2 + $0x8]] }
  0x48   :  { %v167_v5 = vadd.f32 %v166_v60, %v163_v53  ;;  %v185_v6 = vstv %s892_s16  ;;  %v188_v7 = vstv %s894_s17  ;;  %v177_v13 = vstv %s900_s18  ;;  %s957_s9 = sld [smem:[#allocation2 + $0x1c]]  ;;  %s959_s10 = sld [smem:[#allocation7 + $0x17]] }
  0x49   :  { %v151_v8 = vmul.f32 %v150_v45, %v148_v2  ;;  %v155_v9 = vmul.f32 %v154_v58, %v148_v2  ;;  %v159_v10 = vmul.f32 %v158_v59, %v148_v2  ;;  %v186_v11 = vmul.f32 %v185_v6, %v826_v0  ;;  %s965_s11 = sld [smem:[#allocation6 + $0x8]]  ;;  %s968_s12 = sld [smem:[#allocation2 + $0x9]] }
  0x4a   :  { %v170_v12 = vadd.f32 %v169_v61, %v167_v5  ;;  %v181_v14 = vstv %s902_s19  ;;  %v189_v15 = vmul.f32 %v188_v7, %v833_v1  ;;  %v192_v18 = vstv %s906_s20  ;;  %s972_s13 = sld [smem:[#allocation7 + $0x18]]  ;;  %s975_s14 = sld [smem:[#allocation7 + $0x19]] }
  0x4b   :  { %v152_v16 = vadd.f32 %v151_v8, %v129_v62  ;;  %v156_v17 = vadd.f32 %v155_v9, %v133_v63  ;;  %v196_v19 = vstv %s908_s21  ;;  %v160_v20 = vadd.f32 %v159_v10, %v137_v4  ;;  %s980_s0 = sld [smem:[#allocation7 + $0x1a]]  ;;  %s982_s1 = sld [smem:[#allocation2 + $0x1d]] }
  0x4c   :  { %v171_v21 = vmax.f32 %v170_v12, 0.0  ;;  %v190_v22 = vadd.f32 %v189_v15, %v186_v11  ;;  %v208_v23 = vstv %s913_s23  ;;  %v200_v24 = vstv %s911_s22  ;;  %s985_s3 = sld [smem:[#allocation6 + $0x9]]  ;;  %s989_s15 = sld [smem:[#allocation2 + $0xa]] }
  0x4d   :  { %v204_v25 = vstv %s915_s24  ;;  %v209_v26 = vmul.f32 %v208_v23, %v826_v0  ;;  %v211_v27 = vstv %s917_s25  ;;  %v215_v33 = vstv %s923_s26  ;;  %s991_s16 = sld [smem:[#allocation2 + $0x1e]]  ;;  %s996_s17 = sld [smem:[#allocation7 + $0x1b]] }
  0x4e   :  { %v174_v28 = vmul.f32 %v173_v3, %v171_v21  ;;  %v178_v29 = vmul.f32 %v177_v13, %v171_v21  ;;  %v182_v30 = vmul.f32 %v181_v14, %v171_v21  ;;  %v193_v31 = vadd.f32 %v192_v18, %v190_v22  ;;  %s999_s18 = sld [smem:[#allocation7 + $0x1c]]  ;;  %s1001_s19 = sld [smem:[#allocation7 + $0x1d]] }
  0x4f   :  { %v212_v32 = vmul.f32 %v211_v27, %v833_v1  ;;  %v219_v34 = vstv %s926_s27  ;;  %v231_v35 = vstv %s928_s2  ;;  %v223_v39 = vstv %s932_s28  ;;  %s1004_s20 = sld [smem:[#allocation6 + $0xa]]  ;;  %s1006_s21 = sld [smem:[#allocation7 + $0x1e]] }
  0x50   :  { %v175_v36 = vadd.f32 %v174_v28, %v152_v16  ;;  %v179_v37 = vadd.f32 %v178_v29, %v156_v17  ;;  %v194_v38 = vmax.f32 %v193_v31, 0.0  ;;  %v183_v40 = vadd.f32 %v182_v30, %v160_v20  ;;  %s1009_s22 = sld [smem:[#allocation7 + $0x1f]]  ;;  %s1011_s23 = sld [smem:[#allocation2 + $0xb]] }
  0x51   :  { %v213_v41 = vadd.f32 %v212_v32, %v209_v26  ;;  %v232_v42 = vmul.f32 %v231_v35, %v826_v0  ;;  %v234_v43 = vstv %s935_s29  ;;  %v227_v49 = vstv %s940_s30  ;;  %s1013_s24 = sld [smem:[#allocation7 + $0x20]]  ;;  %s1015_s25 = sld [smem:[#allocation2 + $0x1f]] }
  0x52   :  { %v197_v44 = vmul.f32 %v196_v19, %v194_v38  ;;  %v201_v45 = vmul.f32 %v200_v24, %v194_v38  ;;  %v205_v46 = vmul.f32 %v204_v25, %v194_v38  ;;  %v235_v47 = vmul.f32 %v234_v43, %v833_v1  ;;  %s1021_s26 = sld [smem:[#allocation6 + $0xb]]  ;;  %s1023_s27 = sld [smem:[#allocation7 + $0x21]] }
  0x53   :  { %v216_v48 = vadd.f32 %v215_v33, %v213_v41  ;;  %v238_v50 = vstv %s944_s6  ;;  %v242_v51 = vstv %s946_s4  ;;  %v246_v55 = vstv %s949_s7  ;;  %s1026_s2 = sld [smem:[#allocation2 + $0xc]]  ;;  %s1028_s28 = sld [smem:[#allocation2 + $0x20]] }
  0x54   :  { %v198_v52 = vadd.f32 %v197_v44, %v175_v36  ;;  %v202_v53 = vadd.f32 %v201_v45, %v179_v37  ;;  %v236_v54 = vadd.f32 %v235_v47, %v232_v42  ;;  %v206_v56 = vadd.f32 %v205_v46, %v183_v40  ;;  %s1034_s29 = sld [smem:[#allocation6 + $0xc]]  ;;  %s1042_s30 = sld [smem:[#allocation7 + $0x22]] }
  0x55   :  { %v217_v57 = vmax.f32 %v216_v48, 0.0  ;;  %v254_v58 = vstv %s955_s8  ;;  %v257_v59 = vstv %s957_s9  ;;  %v250_v61 = vstv %s959_s10  ;;  %s1044_s6 = sld [smem:[#allocation7 + $0x23]]  ;;  %s1047_s4 = sld [smem:[#allocation7 + $0x24]] }
  0x56   :  { %v239_v60 = vadd.f32 %v238_v50, %v236_v54  ;;  %v255_v62 = vmul.f32 %v254_v58, %v826_v0  ;;  %v258_v63 = vmul.f32 %v257_v59, %v833_v1  ;;  %v261_v5 = vstv %s965_s11  ;;  %s1049_s7 = sld [smem:[#allocation2 + $0xd]]  ;;  %s1058_s9 = sld [smem:[#allocation2 + $0x21]] }
  0x57   :  { %v220_v2 = vmul.f32 %v219_v34, %v217_v57  ;;  %v224_v3 = vmul.f32 %v223_v39, %v217_v57  ;;  %v228_v4 = vmul.f32 %v227_v49, %v217_v57  ;;  %v277_v8 = vstv %s968_s12  ;;  %s1056_s8 = sld [smem:[#allocation7 + $0x25]]  ;;  %s1064_s10 = sld [smem:[#allocation7 + $0x26]] }
  0x58   :  { %v240_v6 = vmax.f32 %v239_v60, 0.0  ;;  %v259_v7 = vadd.f32 %v258_v63, %v255_v62  ;;  %v265_v12 = vstv %s972_s13  ;;  %v269_v17 = vstv %s975_s14  ;;  %s1066_s11 = sld [smem:[#allocation6 + $0xd]]  ;;  %s1068_s12 = sld [smem:[#allocation2 + $0xe]] }
  0x59   :  { %v221_v9 = vadd.f32 %v220_v2, %v198_v52  ;;  %v225_v10 = vadd.f32 %v224_v3, %v202_v53  ;;  %v229_v11 = vadd.f32 %v228_v4, %v206_v56  ;;  %v273_v18 = vstv %s980_s0  ;;  %s1073_s13 = sld [smem:[#allocation7 + $0x27]]  ;;  %s1075_s14 = sld [smem:[#allocation7 + $0x28]] }
  0x5a   :  { %v243_v13 = vmul.f32 %v242_v51, %v240_v6  ;;  %v247_v14 = vmul.f32 %v246_v55, %v240_v6  ;;  %v251_v15 = vmul.f32 %v250_v61, %v240_v6  ;;  %v262_v16 = vadd.f32 %v261_v5, %v259_v7  ;;  %s1077_s0 = sld [smem:[#allocation7 + $0x29]] }
  0x5b   :  { %v278_v19 = vmul.f32 %v277_v8, %v826_v0  ;;  %v280_v20 = vstv %s982_s1  ;;  %v284_v24 = vstv %s985_s3  ;;  %v300_v27 = vstv %s989_s15  ;;  %s1079_s1 = sld [smem:[#allocation2 + $0x22]]  ;;  %s1085_s3 = sld [smem:[#allocation6 + $0xe]] }
  0x5c   :  { %v244_v21 = vadd.f32 %v243_v13, %v221_v9  ;;  %v248_v22 = vadd.f32 %v247_v14, %v225_v10  ;;  %v263_v23 = vmax.f32 %v262_v16, 0.0  ;;  %v252_v25 = vadd.f32 %v251_v15, %v229_v11  ;;  %s1087_s15 = sld [smem:[#allocation7 + $0x2a]] }
  0x5d   :  { %v281_v26 = vmul.f32 %v280_v20, %v833_v1  ;;  %v303_v28 = vstv %s991_s16  ;;  %v301_v32 = vmul.f32 %v300_v27, %v826_v0  ;;  %v288_v34 = vstv %s996_s17  ;;  %s1089_s16 = sld [smem:[#allocation2 + $0xf]]  ;;  %s1091_s17 = sld [smem:[#allocation2 + $0x23]] }
  0x5e   :  { %v266_v29 = vmul.f32 %v265_v12, %v263_v23  ;;  %v270_v30 = vmul.f32 %v269_v17, %v263_v23  ;;  %v274_v31 = vmul.f32 %v273_v18, %v263_v23  ;;  %v292_v35 = vstv %s999_s18  ;;  %s1096_s18 = sld [smem:[#allocation7 + $0x2b]] }
  0x5f   :  { %v282_v33 = vadd.f32 %v281_v26, %v278_v19  ;;  %v304_v36 = vmul.f32 %v303_v28, %v833_v1  ;;  %v296_v38 = vstv %s1001_s19  ;;  %v307_v39 = vstv %s1004_s20  ;;  %s1098_s19 = sld [smem:[#allocation7 + $0x2c]]  ;;  %s1100_s20 = sld [smem:[#allocation6 + $0xf]] }
  0x60   :  { %v267_v37 = vadd.f32 %v266_v29, %v244_v21  ;;  %v311_v40 = vstv %s1006_s21  ;;  %v271_v41 = vadd.f32 %v270_v30, %v248_v22  ;;  %v323_v44 = vstv %s1011_s23  ;;  %s1106_s21 = sld [smem:[#allocation7 + $0x2d]]  ;;  %s1111_s23 = sld [smem:[#allocation2 + $0x24]] }
  0x61   :  { %v285_v42 = vadd.f32 %v284_v24, %v282_v33  ;;  %v305_v43 = vadd.f32 %v304_v36, %v301_v32  ;;  %v275_v45 = vadd.f32 %v274_v31, %v252_v25  ;;  %v315_v46 = vstv %s1009_s22  ;;  %s1109_s22 = sld [smem:[#allocation2 + $0x10]] }
  0x62   :  { %v324_v47 = vmul.f32 %v323_v44, %v826_v0  ;;  %v326_v48 = vstv %s1015_s25  ;;  %v319_v51 = vstv %s1013_s24  ;;  %v330_v53 = vstv %s1021_s26  ;;  %s1115_s24 = sld [smem:[#allocation7 + $0x2e]]  ;;  %s1117_s25 = sld [smem:[#allocation6 + $0x10]] }
  0x63   :  { %v286_v49 = vmax.f32 %v285_v42, 0.0  ;;  %v308_v50 = vadd.f32 %v307_v39, %v305_v43  ;;  %v327_v52 = vmul.f32 %v326_v48, %v833_v1  ;;  %v334_v54 = vstv %s1023_s27  ;;  %s1126_s26 = sld [smem:[#allocation7 + $0x2f]]  ;;  %s1128_s27 = sld [smem:[#allocation2 + $0x11]] }
  0x64   :  { %v346_v55 = vstv %s1026_s2  ;;  %v349_v56 = vstv %s1028_s28  ;;  %v353_v2 = vstv %s1034_s29  ;;  %v338_v11 = vstv %s1042_s30  ;;  %s1132_s2 = sld [smem:[#allocation7 + $0x30]]  ;;  %s1134_s28 = sld [smem:[#allocation7 + $0x31]] }
  0x65   :  { %v289_v57 = vmul.f32 %v288_v34, %v286_v49  ;;  %v293_v58 = vmul.f32 %v292_v35, %v286_v49  ;;  %v297_v59 = vmul.f32 %v296_v38, %v286_v49  ;;  %v309_v60 = vmax.f32 %v308_v50, 0.0  ;;  %s1139_s29 = sld [smem:[#allocation2 + $0x25]]  ;;  %s1144_s30 = sld [smem:[#allocation7 + $0x32]] }
  0x66   :  { %v328_v61 = vadd.f32 %v327_v52, %v324_v47  ;;  %v347_v62 = vmul.f32 %v346_v55, %v826_v0  ;;  %v350_v63 = vmul.f32 %v349_v56, %v833_v1  ;;  %v342_v12 = vstv %s1044_s6  ;;  %s1146_s6 = sld [smem:[#allocation6 + $0x11]] }
  0x67   :  { %v290_v3 = vadd.f32 %v289_v57, %v267_v37  ;;  %v294_v4 = vadd.f32 %v293_v58, %v271_v41  ;;  %v298_v5 = vadd.f32 %v297_v59, %v275_v45  ;;  %v312_v6 = vmul.f32 %v311_v40, %v309_v60 }
  0x68   :  { %v316_v7 = vmul.f32 %v315_v46, %v309_v60  ;;  %v320_v8 = vmul.f32 %v319_v51, %v309_v60  ;;  %v331_v9 = vadd.f32 %v330_v53, %v328_v61  ;;  %v351_v10 = vadd.f32 %v350_v63, %v347_v62 }
  0x69   :  { %v357_v13 = vstv %s1047_s4  ;;  %v369_v14 = vstv %s1049_s7  ;;  %v313_v15 = vadd.f32 %v312_v6, %v290_v3  ;;  %v361_v20 = vstv %s1056_s8  ;;  %s1150_s4 = sld [smem:[#allocation2 + $0x12]]  ;;  %s1152_s7 = sld [smem:[#allocation2 + $0x26]] }
  0x6a   :  { %v317_v16 = vadd.f32 %v316_v7, %v294_v4  ;;  %v332_v17 = vmax.f32 %v331_v9, 0.0  ;;  %v354_v18 = vadd.f32 %v353_v2, %v351_v10  ;;  %v321_v19 = vadd.f32 %v320_v8, %v298_v5  ;;  %s1156_s8 = sld [smem:[#allocation7 + $0x33]] }
  0x6b   :  { %v370_v21 = vmul.f32 %v369_v14, %v826_v0  ;;  %v372_v22 = vstv %s1058_s9  ;;  %v365_v27 = vstv %s1064_s10  ;;  %v376_v29 = vstv %s1066_s11  ;;  %s1160_s9 = sld [smem:[#allocation7 + $0x34]]  ;;  %s1162_s10 = sld [smem:[#allocation6 + $0x12]] }
  0x6c   :  { %v335_v23 = vmul.f32 %v334_v54, %v332_v17  ;;  %v339_v24 = vmul.f32 %v338_v11, %v332_v17  ;;  %v343_v25 = vmul.f32 %v342_v12, %v332_v17  ;;  %v355_v26 = vmax.f32 %v354_v18, 0.0  ;;  %s1166_s11 = sld [smem:[#allocation7 + $0x35]] }
  0x6d   :  { %v373_v28 = vmul.f32 %v372_v22, %v833_v1  ;;  %v392_v30 = vstv %s1068_s12  ;;  %v380_v34 = vstv %s1073_s13  ;;  %v384_v37 = vstv %s1075_s14  ;;  %s1168_s12 = sld [smem:[#allocation2 + $0x13]]  ;;  %s1170_s13 = sld [smem:[#allocation2 + $0x27]] }
  0x6e   :  { %v336_v31 = vadd.f32 %v335_v23, %v313_v15  ;;  %v340_v32 = vadd.f32 %v339_v24, %v317_v16  ;;  %v358_v33 = vmul.f32 %v357_v13, %v355_v26  ;;  %v362_v35 = vmul.f32 %v361_v20, %v355_v26  ;;  %s1174_s14 = sld [smem:[#allocation7 + $0x36]] }
  0x6f   :  { %v374_v36 = vadd.f32 %v373_v28, %v370_v21  ;;  %v393_v38 = vmul.f32 %v392_v30, %v826_v0  ;;  %v344_v39 = vadd.f32 %v343_v25, %v321_v19  ;;  %v366_v40 = vmul.f32 %v365_v27, %v355_v26 }
  0x70   :  { %v388_v41 = vstv %s1077_s0  ;;  %v395_v42 = vstv %s1079_s1  ;;  %v359_v43 = vadd.f32 %v358_v33, %v336_v31  ;;  %v399_v46 = vstv %s1085_s3  ;;  %s1176_s0 = sld [smem:[#allocation7 + $0x37]]  ;;  %s1180_s1 = sld [smem:[#allocation7 + $0x38]] }
  0x71   :  { %v377_v44 = vadd.f32 %v376_v29, %v374_v36  ;;  %v396_v45 = vmul.f32 %v395_v42, %v833_v1  ;;  %v363_v47 = vadd.f32 %v362_v35, %v340_v32  ;;  %v403_v48 = vstv %s1087_s15  ;;  %s1182_s3 = sld [smem:[#allocation6 + $0x13]]  ;;  %s1192_s15 = sld [smem:[#allocation7 + $0x39]] }
  0x72   :  { %v415_v49 = vstv %s1089_s16  ;;  %v418_v50 = vstv %s1091_s17  ;;  %v367_v55 = vadd.f32 %v366_v40, %v344_v39  ;;  %v407_v56 = vstv %s1096_s18  ;;  %s1196_s16 = sld [smem:[#allocation7 + $0x3a]]  ;;  %s1198_s17 = sld [smem:[#allocation7 + $0x3b]] }
  0x73   :  { %v378_v51 = vmax.f32 %v377_v44, 0.0  ;;  %v397_v52 = vadd.f32 %v396_v45, %v393_v38  ;;  %v416_v53 = vmul.f32 %v415_v49, %v826_v0  ;;  %v419_v54 = vmul.f32 %v418_v50, %v833_v1  ;;  %s1207_s18 = sld [smem:[#allocation9]] }
  0x74   :  { %v411_v57 = vstv %s1098_s19  ;;  %v422_v58 = vstv %s1100_s20  ;;  %v426_v2 = vstv %s1106_s21  ;;  %v438_v3 = vstv %s1109_s22  ;;  %s676_s19 = sld [smem:[#allocation9 + $0x1]]  ;;  %s677_s20 = sld [smem:[#allocation9 + $0x2]] }
  0x75   :  { %v381_v59 = vmul.f32 %v380_v34, %v378_v51  ;;  %v385_v60 = vmul.f32 %v384_v37, %v378_v51  ;;  %v389_v61 = vmul.f32 %v388_v41, %v378_v51  ;;  %v400_v62 = vadd.f32 %v399_v46, %v397_v52  ;;  %s763_s21 = smov [#allocation10]  }
  0x76   :  { %v420_v63 = vadd.f32 %v419_v54, %v416_v53  ;;  %v441_v4 = vstv %s1111_s23  ;;  %v430_v7 = vstv %s1115_s24  ;;  %v445_v8 = vstv %s1117_s25  ;;  %s548_s22 = sshll.u32 %s763_s21, 4  ;;  %s549_s22 = int_to_ptr.vmem [resolvable:$true] %s548_s22 }
  0x77   :  { %v382_v5 = vadd.f32 %v381_v59, %v359_v43  ;;  %v401_v6 = vmax.f32 %v400_v62, 0.0  ;;  %v386_v9 = vadd.f32 %v385_v60, %v363_v47  ;;  %v439_v11 = vmul.f32 %v438_v3, %v826_v0  ;;  %s729_s23 = scalar_lea.vmem %s549_s22, 64  ;;  %p734_p5 = scmp.lt.s32.totalorder %s549_s22, %s549_s22 }
  0x78   :  { %v423_v10 = vadd.f32 %v422_v58, %v420_v63  ;;  %v442_v12 = vmul.f32 %v441_v4, %v833_v1  ;;  %v390_v13 = vadd.f32 %v389_v61, %v367_v55  ;;  %v434_v18 = vstv %s1126_s26  ;;  %p730_p4 = scmp.ne.s32.totalorder %s549_s22, %s729_s23  ;;  %p735_p6 = scmp.lt.s32.totalorder %s729_s23, %s729_s23 }
  0x79   :  { %v404_v14 = vmul.f32 %v403_v48, %v401_v6  ;;  %v408_v15 = vmul.f32 %v407_v56, %v401_v6  ;;  %v412_v16 = vmul.f32 %v411_v57, %v401_v6  ;;  %v461_v20 = vstv %s1128_s27 }
  0x7a   :  { %v424_v17 = vmax.f32 %v423_v10, 0.0  ;;  %v443_v19 = vadd.f32 %v442_v12, %v439_v11  ;;  %v449_v22 = vstv %s1132_s2  ;;  %v453_v23 = vstv %s1134_s28  ;;  %p736_p7 = por %p735_p6, %p734_p5 }
  0x7b   :  { %v405_v21 = vadd.f32 %v404_v14, %v382_v5  ;;  %v409_v24 = vadd.f32 %v408_v15, %v386_v9  ;;  %v413_v28 = vadd.f32 %v412_v16, %v390_v13  ;;  %v462_v30 = vmul.f32 %v461_v20, %v826_v0 }
  0x7c   :  { %v427_v25 = vmul.f32 %v426_v2, %v424_v17  ;;  %v431_v26 = vmul.f32 %v430_v7, %v424_v17  ;;  %v446_v27 = vadd.f32 %v445_v8, %v443_v19  ;;  %v435_v29 = vmul.f32 %v434_v18, %v424_v17  ;;  %p737_p8 = pnand %p736_p7, %p730_p4 }
  0x7d   :  { %v464_v31 = vstv %s1139_s29  ;;  %v457_v33 = vstv %s1144_s30  ;;  %v468_v34 = vstv %s1146_s6  ;;  %v484_v37 = vstv %s1150_s4 }
  0x7e   :  { %v447_v32 = vmax.f32 %v446_v27, 0.0  ;;  %v428_v35 = vadd.f32 %v427_v25, %v405_v21  ;;  %v465_v36 = vmul.f32 %v464_v31, %v833_v1  ;;  %v487_v38 = vstv %s1152_s7 }
  0x7f   :  { %v432_v39 = vadd.f32 %v431_v26, %v409_v24  ;;  %v485_v42 = vmul.f32 %v484_v37, %v826_v0  ;;  %v436_v43 = vadd.f32 %v435_v29, %v413_v28  ;;  %v488_v46 = vmul.f32 %v487_v38, %v833_v1 }
  0x80   :  { %v450_v40 = vmul.f32 %v449_v22, %v447_v32  ;;  %v454_v41 = vmul.f32 %v453_v23, %v447_v32  ;;  %v458_v44 = vmul.f32 %v457_v33, %v447_v32  ;;  %v466_v45 = vadd.f32 %v465_v36, %v462_v30 }
  0x81   :  { %v472_v47 = vstv %s1156_s8  ;;  %v476_v48 = vstv %s1160_s9  ;;  %v491_v49 = vstv %s1162_s10  ;;  %v480_v51 = vstv %s1166_s11 }
  0x82   :  { %v469_v50 = vadd.f32 %v468_v34, %v466_v45  ;;  %v489_v52 = vadd.f32 %v488_v46, %v485_v42  ;;  %v507_v53 = vstv %s1168_s12  ;;  %v451_v54 = vadd.f32 %v450_v40, %v428_v35 }
  0x83   :  { %v455_v55 = vadd.f32 %v454_v41, %v432_v39  ;;  %v508_v56 = vmul.f32 %v507_v53, %v826_v0  ;;  %v510_v57 = vstv %s1170_s13  ;;  %v459_v58 = vadd.f32 %v458_v44, %v436_v43 }
  0x84   :  { %v470_v59 = vmax.f32 %v469_v50, 0.0  ;;  %v492_v60 = vadd.f32 %v491_v49, %v489_v52  ;;  %v511_v61 = vmul.f32 %v510_v57, %v833_v1  ;;  %v495_v62 = vstv %s1174_s14 }
  0x85   :  { %v499_v63 = vstv %s1176_s0  ;;  %v503_v2 = vstv %s1180_s1  ;;  %v514_v3 = vstv %s1182_s3  ;;  %v518_v14 = vstv %s1192_s15 }
  0x86   :  { %v473_v4 = vmul.f32 %v472_v47, %v470_v59  ;;  %v477_v5 = vmul.f32 %v476_v48, %v470_v59  ;;  %v481_v6 = vmul.f32 %v480_v51, %v470_v59  ;;  %v493_v7 = vmax.f32 %v492_v60, 0.0 }
  0x87   :  { %v512_v0 = vadd.f32 %v511_v61, %v508_v56  ;;  %v522_v15 = vstv %s1196_s16  ;;  %v526_v16 = vstv %s1198_s17  ;;  %v530_v24 = vstv %s1207_s18 }
  0x88   :  { %v474_v8 = vadd.f32 %v473_v4, %v451_v54  ;;  %v478_v9 = vadd.f32 %v477_v5, %v455_v55  ;;  %v482_v1 = vadd.f32 %v481_v6, %v459_v58  ;;  %v496_v10 = vmul.f32 %v495_v62, %v493_v7 }
  0x89   :  { %v500_v11 = vmul.f32 %v499_v63, %v493_v7  ;;  %v504_v12 = vmul.f32 %v503_v2, %v493_v7  ;;  %v515_v13 = vadd.f32 %v514_v3, %v512_v0  ;;  %v535_v25 = vstv %s676_s19 }
  0x8a   :  { %v497_v17 = vadd.f32 %v496_v10, %v474_v8  ;;  %v539_v26 = vstv %s677_s20 }
  0x8b   :  { %v501_v18 = vadd.f32 %v500_v11, %v478_v9  ;;  %v505_v19 = vadd.f32 %v504_v12, %v482_v1  ;;  %v516_v20 = vmax.f32 %v515_v13, 0.0 }
  0x8d   :  { %v519_v21 = vmul.f32 %v518_v14, %v516_v20  ;;  %v523_v22 = vmul.f32 %v522_v15, %v516_v20  ;;  %v527_v23 = vmul.f32 %v526_v16, %v516_v20 }
  0x8f   :  { %v520_v27 = vadd.f32 %v519_v21, %v497_v17  ;;  %v524_v28 = vadd.f32 %v523_v22, %v501_v18  ;;  %v528_v29 = vadd.f32 %v527_v23, %v505_v19 }
  0x91   :  { %v531_v30 = vadd.f32 %v530_v24, %v520_v27  ;;  %v536_v31 = vadd.f32 %v535_v25, %v524_v28  ;;  %v540_v32 = vadd.f32 %v539_v26, %v528_v29 }
  0x93   :  { %533 = vst.msk [vmem:[#allocation10] sm:$0x1] %vm532_vm0, %v531_v30  ;;  %537 = vst.msk [vmem:[#allocation10 + $0x1] sm:$0x1] %vm532_vm0, %v536_v31 }
  0x94   :  { %541 = vst.msk [vmem:[#allocation10 + $0x2] sm:$0x1] %vm532_vm0, %v540_v32 }
  0x95   :  { %740 = shalt.err (!%p737_p8)
}
  0x96   :  { %s741_s26 = scalar_lea.hbm %s1230_s5, 64 }
  0x97   :  { %p742_p9 = scmp.ne.s32.totalorder %s1230_s5, %s741_s26  ;;  %p745_p10 = scmp.lt.u32.totalorder %s741_s26, %s1230_s5 }
  0x99   :  { %p747_p11 = pnand %p745_p10, %p742_p9 }
  0x9b   :  { %750 = shalt.err (!%p747_p11)
}
  0x9c   :  { %551 = dma.vmem_to_hbm [thread:$0]  %s549_s22, 64, %s1230_s5, [#allocation3]  }
  0x9d   :  { %757 = dma.done.wait [#allocation3], 64  }
  0x9e   :  { %758 = vsyncadd [#allocation3], 4294967232 }
  0x9f   :  { %555 = vsyncpa [#allocation3], 1 }
  0xa0   :  { %556 = vsyncpa [#allocation4], 1 }
  0xa1   :  { %557 = vsyncpa [#allocation5], 1 }
  0xa2   :  { %558 = vsyncpa [#allocation8], 1 }

</bundles_post_ra>
